<compile_context>
chip_gen: v7x
topology: tpu7x:2x2x1
jax: 0.10.0
libtpu: 0.0.40
codegen_flags: <defaults>
</compile_context>

<pallas_src>
import functools

import jax
import jax.numpy as jnp
from jax.experimental import pallas as pl
from jax.experimental.pallas import tpu as pltpu

DECAY = 0.9
THRESHOLD = 1.0
LANE = 128
DEFAULT_TILE_ROWS = 4096        # 4096 x 128 x 4 B = 2 MiB f32 block
_MIN_GRID = 4                   # enough grid steps for both v7x TensorCores
_MIN_TILE_ROWS = 512            # ...but never shrink blocks below 256 KiB
_VMEM_LIMIT = 32 * 1024 * 1024  # explicit (v5e default scoped limit is 16 MiB)


def _cdiv(a, b):
    return (a + b - 1) // b


def _round_up(v, m):
    return ((v + m - 1) // m) * m


def _pick_tile_rows(rows, tile_rows):
    """Choose a (8,128)-legal row-tile for a (rows, 128) slab."""
    if rows % 8 != 0 and rows <= tile_rows:
        # Single block equal to the full array dims (legal even if rows % 8 != 0).
        return rows
    tile_r = min(tile_rows, rows)
    tile_r = max(8, (tile_r // 8) * 8)          # multiple of 8 sublanes
    if rows >= _MIN_GRID * _MIN_TILE_ROWS:
        # Keep >= _MIN_GRID grid steps so megacore (v7x) has work on both TCs.
        cap = _round_up(_cdiv(rows, _MIN_GRID), 8)
        tile_r = min(tile_r, cap)
    return tile_r


def _to_slab(flat, rows):
    """Lane-dense (rows, 128) view; pads only when total % 128 != 0."""
    total = flat.shape[0]
    padded = rows * LANE
    if padded != total:
        flat = jnp.pad(flat, (0, padded - total))
    return flat.reshape(rows, LANE)


# ---------------------------------------------------------------------------
# Single-step kernel (matches LIFNeuron.forward).
# ---------------------------------------------------------------------------
def _lif_kernel(x_ref, pot_ref, spikes_ref, pot_out_ref):
    pot = DECAY * pot_ref[...] + x_ref[...]
    spiked = pot >= THRESHOLD
    spikes_ref[...] = spiked.astype(spikes_ref.dtype)
    pot_out_ref[...] = jnp.where(spiked, 0.0, pot)


@functools.partial(jax.jit, static_argnames=("tile_rows",), donate_argnums=(1,))
def lif_forward(input_current, potential, *, tile_rows=DEFAULT_TILE_ROWS):
    """One LIFNeuron.forward step.

    Returns (spikes, new_potential), both shaped/dtyped like input_current.
    `potential` is donated: its HBM buffer is reused for new_potential.
    """
    orig_shape = input_current.shape
    dtype = input_current.dtype
    total = input_current.size
    potential = potential.astype(dtype)

    rows = _cdiv(total, LANE)
    tile_r = _pick_tile_rows(rows, tile_rows)

    x2d = _to_slab(input_current.reshape(-1), rows)
    p2d = _to_slab(potential.reshape(-1), rows)

    spec = pl.BlockSpec((tile_r, LANE), lambda i: (i, 0))
    spikes2d, pot2d = pl.pallas_call(
        _lif_kernel,
        out_shape=(
            jax.ShapeDtypeStruct((rows, LANE), dtype),
            jax.ShapeDtypeStruct((rows, LANE), dtype),
        ),
        grid=(_cdiv(rows, tile_r),),
        in_specs=[spec, spec],
        out_specs=(spec, spec),
        input_output_aliases={1: 1},
        compiler_params=pltpu.CompilerParams(
            dimension_semantics=("parallel",),
            vmem_limit_bytes=_VMEM_LIMIT,
        ),
    )(x2d, p2d)

    if rows * LANE != total:  # ragged: undo the small tail pad
        spikes2d = spikes2d.reshape(-1)[:total]
        pot2d = pot2d.reshape(-1)[:total]
    return spikes2d.reshape(orig_shape), pot2d.reshape(orig_shape)


# ---------------------------------------------------------------------------
# Fused T-step rollout: potential stays resident in VMEM across time steps.
# Per-step HBM traffic: read x_t + write spikes_t only (8 B/elem for f32).
# ---------------------------------------------------------------------------
def _lif_rollout_kernel(x_ref, pot_in_ref, spikes_ref, pot_out_ref):
    @pl.when(pl.program_id(1) == 0)
    def _():
        pot_out_ref[...] = pot_in_ref[...]

    pot = DECAY * pot_out_ref[...] + x_ref[0]
    spiked = pot >= THRESHOLD
    spikes_ref[0] = spiked.astype(spikes_ref.dtype)
    pot_out_ref[...] = jnp.where(spiked, 0.0, pot)


@functools.partial(jax.jit, static_argnames=("tile_rows",), donate_argnums=(1,))
def lif_rollout(input_currents, potential, *, tile_rows=DEFAULT_TILE_ROWS):
    """T fused LIF steps.

    Args:
      input_currents: f32[T, ...] stacked per-step inputs.
      potential:      f32[...]   initial membrane potential (donated).

    Returns:
      (spikes[T, ...], final_potential[...]).
    """
    T = input_currents.shape[0]
    step_shape = input_currents.shape[1:]
    dtype = input_currents.dtype
    total = potential.size
    potential = potential.astype(dtype)

    rows = _cdiv(total, LANE)
    tile_r = _pick_tile_rows(rows, tile_rows)
    padded = rows * LANE

    x_flat = input_currents.reshape(T, -1)
    if padded != total:
        x_flat = jnp.pad(x_flat, ((0, 0), (0, padded - total)))
    x3d = x_flat.reshape(T, rows, LANE)
    p2d = _to_slab(potential.reshape(-1), rows)

    x_spec = pl.BlockSpec((1, tile_r, LANE), lambda i, t: (t, i, 0))
    p_spec = pl.BlockSpec((tile_r, LANE), lambda i, t: (i, 0))  # resident over t

    spikes3d, pot2d = pl.pallas_call(
        _lif_rollout_kernel,
        out_shape=(
            jax.ShapeDtypeStruct((T, rows, LANE), dtype),
            jax.ShapeDtypeStruct((rows, LANE), dtype),
        ),
        grid=(_cdiv(rows, tile_r), T),
        in_specs=[x_spec, p_spec],
        out_specs=(x_spec, p_spec),
        input_output_aliases={1: 1},
        compiler_params=pltpu.CompilerParams(
            dimension_semantics=("parallel", "arbitrary"),
            vmem_limit_bytes=_VMEM_LIMIT,
        ),
    )(x3d, p2d)

    if padded != total:
        spikes3d = spikes3d.reshape(T, -1)[:, :total]
        pot2d = pot2d.reshape(-1)[:total]
    return spikes3d.reshape((T,) + step_shape), pot2d.reshape(step_shape)


# ---------------------------------------------------------------------------
# Pure-JAX reference (mirrors the PyTorch module exactly).
# ---------------------------------------------------------------------------
def _lif_reference(input_current, potential):
    pot = DECAY * potential + input_current
    spikes = (pot >= THRESHOLD).astype(input_current.dtype)
    return spikes, pot * (1.0 - spikes)


if __name__ == "__main__":
    k1, k2, k3, k4, k5 = jax.random.split(jax.random.PRNGKey(0), 5)

    # --- Small NCHW shape: N=2, C=4, 16x16 (fresh module: potential = 0).
    x1 = jax.random.normal(k1, (2, 4, 16, 16), dtype=jnp.float32) * 2.0
    x2 = jax.random.normal(k2, (2, 4, 16, 16), dtype=jnp.float32) * 2.0
    p0 = jnp.zeros_like(x1)

    ref_s1, ref_p1 = _lif_reference(x1, p0)
    ref_s2, ref_p2 = _lif_reference(x2, ref_p1)

    s1, p1 = lif_forward(x1, p0)      # donates p0 (refs computed above)
    jax.block_until_ready(s1)
    assert jnp.allclose(s1, ref_s1)
    assert jnp.allclose(p1, ref_p1)

    s2, p2 = lif_forward(x2, p1)      # donates p1 (already checked)
    jax.block_until_ready(s2)
    assert jnp.allclose(s2, ref_s2)
    assert jnp.allclose(p2, ref_p2)

    # --- Larger shape: exercises the multi-tile "parallel" path (grid = 4).
    xb = jax.random.normal(k3, (4, 8, 128, 128), dtype=jnp.float32) * 2.0
    pb0 = jnp.zeros_like(xb)
    ref_sb, ref_pb = _lif_reference(xb, pb0)
    sb, pb1 = lif_forward(xb, pb0)
    jax.block_until_ready(sb)
    assert jnp.allclose(sb, ref_sb)
    assert jnp.allclose(pb1, ref_pb)

    # --- Ragged shape (element count not a multiple of 128): tail-pad path.
    xr = jax.random.normal(k4, (2, 3, 15, 17), dtype=jnp.float32) * 2.0
    pr0 = jnp.zeros_like(xr)
    ref_sr, ref_pr = _lif_reference(xr, pr0)
    sr, pr1 = lif_forward(xr, pr0)
    jax.block_until_ready(sr)
    assert jnp.allclose(sr, ref_sr)
    assert jnp.allclose(pr1, ref_pr)

    # --- Fused multi-timestep rollout (T=4): potential resident in VMEM.
    T = 4
    xs = jax.random.normal(k5, (T, 2, 4, 16, 16), dtype=jnp.float32) * 2.0
    pr_init = jnp.zeros(xs.shape[1:], dtype=jnp.float32)

    ref_spikes = []
    ref_pot = pr_init
    for t in range(T):
        st, ref_pot = _lif_reference(xs[t], ref_pot)
        ref_spikes.append(st)
    ref_spikes = jnp.stack(ref_spikes)

    spikes_T, pot_T = lif_rollout(xs, pr_init)   # donates pr_init
    jax.block_until_ready(spikes_T)
    assert jnp.allclose(spikes_T, ref_spikes)
    assert jnp.allclose(pot_T, ref_pot)

    print("KERNEL_OK")
</pallas_src>

<mosaic_0001>
module attributes {stable_mosaic.version = 11 : i64} {
  func.func @_lif_kernel(%arg0: i32, %arg1: memref<16x128xf32, #tpu.memory_space<vmem>>, %arg2: memref<16x128xf32, #tpu.memory_space<vmem>>, %arg3: memref<16x128xf32, #tpu.memory_space<vmem>>, %arg4: memref<16x128xf32, #tpu.memory_space<vmem>>) attributes {dimension_semantics = [#tpu.dimension_semantics<parallel>], iteration_bounds = array<i64: 1>, scalar_prefetch = 0 : i64, scratch_operands = 0 : i64, tpu.core_type = #tpu.core_type<tc>, window_params = [{transform_indices = @transform_0, window_bounds = array<i64: 16, 128>}, {transform_indices = @transform_1, window_bounds = array<i64: 16, 128>}, {transform_indices = @transform_2, window_bounds = array<i64: 16, 128>}, {transform_indices = @transform_3, window_bounds = array<i64: 16, 128>}]} {
    %c0 = arith.constant 0 : index
    %c0_0 = arith.constant 0 : index
    %0 = vector.load %arg2[%c0, %c0_0] : memref<16x128xf32, #tpu.memory_space<vmem>>, vector<16x128xf32>
    %cst = arith.constant 0.899999976 : f32
    %1 = vector.broadcast %cst : f32 to vector<16x128xf32>
    %2 = arith.mulf %1, %0 : vector<16x128xf32>
    %c0_1 = arith.constant 0 : index
    %c0_2 = arith.constant 0 : index
    %3 = vector.load %arg1[%c0_1, %c0_2] : memref<16x128xf32, #tpu.memory_space<vmem>>, vector<16x128xf32>
    %4 = arith.addf %2, %3 : vector<16x128xf32>
    %cst_3 = arith.constant 1.000000e+00 : f32
    %5 = vector.broadcast %cst_3 : f32 to vector<16x128xf32>
    %6 = arith.cmpf oge, %4, %5 : vector<16x128xf32>
    %7 = arith.extui %6 : vector<16x128xi1> to vector<16x128xi32>
    %8 = arith.sitofp %7 : vector<16x128xi32> to vector<16x128xf32>
    %c0_4 = arith.constant 0 : index
    %c0_5 = arith.constant 0 : index
    %9 = vector.load %arg3[%c0_4, %c0_5] : memref<16x128xf32, #tpu.memory_space<vmem>>, vector<16x128xf32>
    tpu.vector_store %arg3[%c0_4, %c0_5], %8 {strides = array<i32>} : memref<16x128xf32, #tpu.memory_space<vmem>>, vector<16x128xf32>,
    %cst_6 = arith.constant 0.000000e+00 : f32
    %10 = vector.broadcast %cst_6 : f32 to vector<16x128xf32>
    %11 = arith.select %6, %10, %4 : vector<16x128xi1>, vector<16x128xf32>
    %c0_7 = arith.constant 0 : index
    %c0_8 = arith.constant 0 : index
    %12 = vector.load %arg4[%c0_7, %c0_8] : memref<16x128xf32, #tpu.memory_space<vmem>>, vector<16x128xf32>
    tpu.vector_store %arg4[%c0_7, %c0_8], %11 {strides = array<i32>} : memref<16x128xf32, #tpu.memory_space<vmem>>, vector<16x128xf32>,
    return
  }
  func.func @transform_0(%arg0: i32) -> (i32, i32) {
    %c0_i32 = arith.constant 0 : i32
    %c0_i32_0 = arith.constant 0 : i32
    return %arg0, %c0_i32 : i32, i32
  }
  func.func @transform_1(%arg0: i32) -> (i32, i32) {
    %c0_i32 = arith.constant 0 : i32
    %c0_i32_0 = arith.constant 0 : i32
    return %arg0, %c0_i32 : i32, i32
  }
  func.func @transform_2(%arg0: i32) -> (i32, i32) {
    %c0_i32 = arith.constant 0 : i32
    %c0_i32_0 = arith.constant 0 : i32
    return %arg0, %c0_i32 : i32, i32
  }
  func.func @transform_3(%arg0: i32) -> (i32, i32) {
    %c0_i32 = arith.constant 0 : i32
    %c0_i32_0 = arith.constant 0 : i32
    return %arg0, %c0_i32 : i32, i32
  }
}

</mosaic_0001>

<bundles_post_ra>
// kernel: lif_forward.1
= control target key start
LH: loop header
LB: loop body
LE: loop exit
PB: predicated region body
PF: predicated region fallthrough
CT: control target
= control target key end

     0   :  { %v44_v8 = vmov 0.0   ;;  %s89_s0 = inlined_call_operand.vmem [shape: f32[16,128], index: 0, kind: input, shape index: {}]   ;;  %s90_s1 = inlined_call_operand.vmem [shape: f32[16,128], index: 1, kind: input, shape index: {}, may-alias: {1,3}]   ;;  %s91_s2 = inlined_call_operand.vmem [shape: f32[16,128], index: 2, kind: output, shape index: {0}]   ;;  %s92_s3 = inlined_call_operand.vmem [shape: f32[16,128], index: 3, kind: output, shape index: {1}, may-alias: {1,3}]  }
   0x1   :  { %v13_v0 = vld [vmem:[%s90_s1] sm:$0xff]  ;;  %v14_v2 = vld [vmem:[%s90_s1 + $0x8] sm:$0xff] }
   0x2   :  { %v17_v1 = vld [vmem:[%s89_s0] sm:$0xff]  ;;  %v15_v3 = vmul.f32 0.9, %v13_v0  ;;  %v16_v4 = vmul.f32 0.9, %v14_v2  ;;  %v18_v5 = vld [vmem:[%s89_s0 + $0x8] sm:$0xff] }
   0x4   :  { %v19_v6 = vadd.f32 %v17_v1, %v15_v3  ;;  %v20_v7 = vadd.f32 %v18_v5, %v16_v4 }
   0x6   :  { %vm21_vm0 = vcmp.ge.f32.partialorder %v19_v6, 1.0  ;;  %vm22_vm1 = vcmp.ge.f32.partialorder %v20_v7, 1.0 }
   0x7   :  { %v41_v9 = vsel %vm21_vm0, 1.0, %v44_v8  ;;  %v42_v10 = vsel %vm22_vm1, 1.0, %v44_v8  ;;  %v29_v11 = vsel %vm21_vm0, 0.0, %v19_v6  ;;  %v30_v12 = vsel %vm22_vm1, 0.0, %v20_v7 }
   0x8   :  { %27 = vst [vmem:[%s91_s2] sm:$0xff] %v41_v9  ;;  %28 = vst [vmem:[%s91_s2 + $0x8] sm:$0xff] %v42_v10 }
   0x9   :  { %31 = vst [vmem:[%s92_s3] sm:$0xff] %v29_v11  ;;  %32 = vst [vmem:[%s92_s3 + $0x8] sm:$0xff] %v30_v12 }

</bundles_post_ra>
